<compile_context>
chip_gen: v6e
topology: v6e:2x2x1
jax: 0.10.0
libtpu: 0.0.40
codegen_flags: <defaults>
</compile_context>

<pallas_src>
import math

import jax
import jax.numpy as jnp
from jax.experimental import pallas as pl
from jax.experimental.pallas import tpu as pltpu


def _round_up(x, m):
    return (x + m - 1) // m * m


# ---------------------------------------------------------------------------
# Parameter prep (glue, run once — NOT per timestep)
# ---------------------------------------------------------------------------
def prepare_params(w_ih, w_hh, b_ih, b_hh, mxu_dtype=jnp.float32, lane=128):
    """Transpose weights for the MXU, pad each gate block to `lane` columns,
    fold biases.  w_ih: (4H, I), w_hh: (4H, H), b_ih/b_hh: (4H,) (PyTorch layout)."""
    w_ih = jnp.asarray(w_ih, jnp.float32)
    w_hh = jnp.asarray(w_hh, jnp.float32)
    b = jnp.asarray(b_ih, jnp.float32) + jnp.asarray(b_hh, jnp.float32)
    H4, I = w_ih.shape
    H = H4 // 4
    Hp = _round_up(H, lane)

    def pad_gate_cols(w_t):  # (rows, 4H) -> (rows, 4Hp), per-gate column padding
        rows = w_t.shape[0]
        out = jnp.zeros((rows, 4 * Hp), jnp.float32)
        for k in range(4):
            out = out.at[:, k * Hp:k * Hp + H].set(w_t[:, k * H:(k + 1) * H])
        return out

    wih_t = pad_gate_cols(w_ih.T)                                        # (I,  4Hp)
    whh_t = jnp.zeros((Hp, 4 * Hp), jnp.float32).at[:H].set(pad_gate_cols(w_hh.T))
    b_row = jnp.zeros((1, 4 * Hp), jnp.float32)
    for k in range(4):
        b_row = b_row.at[0, k * Hp:k * Hp + H].set(b[k * H:(k + 1) * H])

    return {
        "wih_t": wih_t.astype(mxu_dtype),   # (I, 4Hp)   MXU operand dtype
        "whh_t": whh_t.astype(mxu_dtype),   # (Hp, 4Hp)  MXU operand dtype
        "b_row": b_row,                     # (1, 4Hp)   f32 (folded bias)
        "I": I, "H": H, "Hp": Hp,
    }


# ---------------------------------------------------------------------------
# Single-step kernel (exactly DPLSTMCell.forward). Two MXU dots, no wrapper concat.
# ---------------------------------------------------------------------------
def dplstm_cell_kernel(x_ref, h_ref, c_ref, wih_ref, whh_ref, b_ref, hc_ref):
    Hp = c_ref.shape[-1]
    gates = (
        jnp.dot(x_ref[...], wih_ref[...], preferred_element_type=jnp.float32)
        + jnp.dot(h_ref[...].astype(whh_ref.dtype), whh_ref[...],
                  preferred_element_type=jnp.float32)
        + b_ref[...]
    )
    i_t = jax.nn.sigmoid(gates[:, 0 * Hp:1 * Hp])
    f_t = jax.nn.sigmoid(gates[:, 1 * Hp:2 * Hp])
    g_t = jnp.tanh(gates[:, 2 * Hp:3 * Hp])
    o_t = jax.nn.sigmoid(gates[:, 3 * Hp:4 * Hp])

    c_t = f_t * c_ref[...] + i_t * g_t      # elementwise in f32 (v5e-safe)
    h_t = o_t * jnp.tanh(c_t)

    hc_ref[0] = h_t.astype(hc_ref.dtype)
    hc_ref[1] = c_t.astype(hc_ref.dtype)


def dplstm_cell(x, h_prev, c_prev, params):
    """One DPLSTMCell step.  x: (B, I), h_prev/c_prev: (B, H) -> (h_t, c_t)."""
    B, H = h_prev.shape
    I, Hp = params["I"], params["Hp"]
    Bp = _round_up(B, 8)
    mxu = params["wih_t"].dtype

    xp = jnp.zeros((Bp, I), mxu).at[:B].set(x.astype(mxu))
    hp = jnp.zeros((Bp, Hp), jnp.float32).at[:B, :H].set(h_prev.astype(jnp.float32))
    cp = jnp.zeros((Bp, Hp), jnp.float32).at[:B, :H].set(c_prev.astype(jnp.float32))

    vmem = pl.BlockSpec(memory_space=pltpu.MemorySpace.VMEM)
    hc = pl.pallas_call(
        dplstm_cell_kernel,
        out_shape=jax.ShapeDtypeStruct((2, Bp, Hp), jnp.float32),
        in_specs=[vmem] * 6,
        out_specs=vmem,
    )(xp, hp, cp, params["wih_t"], params["whh_t"], params["b_row"])
    return hc[0, :B, :H], hc[1, :B, :H]


# ---------------------------------------------------------------------------
# Sequence kernel: T repeated cell applications, U timesteps per grid iteration.
# Only the recurrent (h @ W_hh^T) matmul is inside the time loop; the x-projection
# (incl. bias) is precomputed and streamed in per block.
# ---------------------------------------------------------------------------
def dplstm_seq_kernel(gx_ref, h0_ref, c0_ref, whh_ref, hseq_ref, cfin_ref,
                      h_sc, c_sc):
    t = pl.program_id(1)
    Hp = h_sc.shape[-1]
    U = gx_ref.shape[0]

    @pl.when(t == 0)
    def _():
        h_sc[...] = h0_ref[...].astype(jnp.float32)
        c_sc[...] = c0_ref[...].astype(jnp.float32)

    # Static unroll over U timesteps inside one grid step (amortizes grid overhead).
    for u in range(U):
        gates = gx_ref[u] + jnp.dot(
            h_sc[...].astype(whh_ref.dtype), whh_ref[...],
            preferred_element_type=jnp.float32)

        i_t = jax.nn.sigmoid(gates[:, 0 * Hp:1 * Hp])
        f_t = jax.nn.sigmoid(gates[:, 1 * Hp:2 * Hp])
        g_t = jnp.tanh(gates[:, 2 * Hp:3 * Hp])
        o_t = jax.nn.sigmoid(gates[:, 3 * Hp:4 * Hp])

        c_t = f_t * c_sc[...] + i_t * g_t
        h_t = o_t * jnp.tanh(c_t)

        # State persists in VMEM scratch across grid steps (no HBM roundtrip).
        h_sc[...] = h_t
        c_sc[...] = c_t
        hseq_ref[u] = h_t.astype(hseq_ref.dtype)

    @pl.when(t == pl.num_programs(1) - 1)
    def _():
        cfin_ref[...] = c_sc[...].astype(cfin_ref.dtype)


def dplstm_cell_sequence(xs, h0, c0, params, *, unroll=4, batch_block=None,
                         out_dtype=jnp.float32):
    """Run T LSTM steps.  xs: (T, B, I) -> (h_seq (T,B,H), h_T, c_T)."""
    T, B, I = xs.shape
    H, Hp = params["H"], params["Hp"]
    Bp = _round_up(B, 8)
    TB = Bp if batch_block is None else batch_block
    assert Bp % TB == 0
    U = math.gcd(T, max(1, unroll))
    mxu = params["wih_t"].dtype

    xs_p = jnp.zeros((T, Bp, I), mxu).at[:, :B, :].set(xs.astype(mxu))

    # (1) Input projection hoisted out of the recurrence: one big (T*B, I) x (I, 4Hp)
    #     matmul at high MXU row utilization (plain XLA, f32 accumulation), bias folded.
    gates_x = (
        jnp.dot(xs_p.reshape(T * Bp, I), params["wih_t"],
                preferred_element_type=jnp.float32).reshape(T, Bp, 4 * Hp)
        + params["b_row"]
    )

    h0_p = jnp.zeros((Bp, Hp), jnp.float32).at[:B, :H].set(h0.astype(jnp.float32))
    c0_p = jnp.zeros((Bp, Hp), jnp.float32).at[:B, :H].set(c0.astype(jnp.float32))

    nb, nt = Bp // TB, T // U

    grid_spec = pltpu.PrefetchScalarGridSpec(
        num_scalar_prefetch=0,
        grid=(nb, nt),                                       # batch outer, time inner
        in_specs=[
            pl.BlockSpec((U, TB, 4 * Hp), lambda b, t: (t, b, 0)),  # gates_x streamed
            pl.BlockSpec((TB, Hp), lambda b, t: (b, 0)),            # h0 (resident per b)
            pl.BlockSpec((TB, Hp), lambda b, t: (b, 0)),            # c0 (resident per b)
            pl.BlockSpec((Hp, 4 * Hp), lambda b, t: (0, 0)),        # W_hh^T (resident)
        ],
        out_specs=[
            pl.BlockSpec((U, TB, Hp), lambda b, t: (t, b, 0)),      # h_seq, lane-dense
            pl.BlockSpec((TB, Hp), lambda b, t: (b, 0)),            # c_T (written at last t)
        ],
        scratch_shapes=[
            pltpu.VMEM((TB, Hp), jnp.float32),                      # h state
            pltpu.VMEM((TB, Hp), jnp.float32),                      # c state
        ],
    )

    # Explicit VMEM budget: resident W_hh^T + double-buffered streamed blocks + state.
    est = (params["whh_t"].size * params["whh_t"].dtype.itemsize
           + 2 * (U * TB * 4 * Hp * 4)                               # gates_x blocks (f32)
           + 2 * (U * TB * Hp * jnp.dtype(out_dtype).itemsize)       # h_seq blocks
           + 8 * (TB * Hp * 4))                                      # h0/c0/c_T/state
    vmem_limit = int(max(2 * est, 16 * 1024 * 1024))

    h_seq, c_fin = pl.pallas_call(
        dplstm_seq_kernel,
        grid_spec=grid_spec,
        out_shape=[
            jax.ShapeDtypeStruct((T, Bp, Hp), out_dtype),
            jax.ShapeDtypeStruct((Bp, Hp), jnp.float32),
        ],
        compiler_params=pltpu.CompilerParams(
            dimension_semantics=("parallel", "arbitrary"),   # batch || cores, time serial
            vmem_limit_bytes=vmem_limit),
    )(gates_x, h0_p, c0_p, params["whh_t"])

    h_seq = h_seq[:, :B, :H]
    c_T = c_fin[:B, :H]
    return h_seq, h_seq[-1], c_T


# ---------------------------------------------------------------------------
# Pure-JAX reference mirroring the PyTorch forward
# ---------------------------------------------------------------------------
def dplstm_cell_ref(x, h_prev, c_prev, w_ih, w_hh, b_ih, b_hh):
    gates = x @ w_ih.T + b_ih + h_prev @ w_hh.T + b_hh
    H = h_prev.shape[1]
    i_t = jax.nn.sigmoid(gates[:, 0 * H:1 * H])
    f_t = jax.nn.sigmoid(gates[:, 1 * H:2 * H])
    g_t = jnp.tanh(gates[:, 2 * H:3 * H])
    o_t = jax.nn.sigmoid(gates[:, 3 * H:4 * H])
    c_t = f_t * c_prev + i_t * g_t
    h_t = o_t * jnp.tanh(c_t)
    return h_t, c_t


if __name__ == "__main__":
    batch = 8
    input_size = 16
    hidden_size = 32
    seq_len = 8

    key = jax.random.PRNGKey(0)
    kx, kh, kc, k1, k2, k3, k4 = jax.random.split(key, 7)

    # reset_parameters(): uniform(-stdv, stdv), stdv = 1/sqrt(hidden)
    stdv = 1.0 / math.sqrt(hidden_size)
    w_ih = jax.random.uniform(k1, (4 * hidden_size, input_size),
                              minval=-stdv, maxval=stdv, dtype=jnp.float32)
    w_hh = jax.random.uniform(k2, (4 * hidden_size, hidden_size),
                              minval=-stdv, maxval=stdv, dtype=jnp.float32)
    b_ih = jax.random.uniform(k3, (4 * hidden_size,),
                              minval=-stdv, maxval=stdv, dtype=jnp.float32)
    b_hh = jax.random.uniform(k4, (4 * hidden_size,),
                              minval=-stdv, maxval=stdv, dtype=jnp.float32)

    xs = jax.random.normal(kx, (seq_len, batch, input_size), dtype=jnp.float32)
    h0 = jax.random.normal(kh, (batch, hidden_size), dtype=jnp.float32)
    c0 = jax.random.normal(kc, (batch, hidden_size), dtype=jnp.float32)

    # Parameter prep done once (transpose, per-gate lane padding, bias fold).
    params_f32 = prepare_params(w_ih, w_hh, b_ih, b_hh, mxu_dtype=jnp.float32)

    # ---- 1) single DPLSTMCell step (matches DPLSTMCell.forward) ----
    h1, c1 = dplstm_cell(xs[0], h0, c0, params_f32)
    jax.block_until_ready((h1, c1))
    h1_ref, c1_ref = dplstm_cell_ref(xs[0], h0, c0, w_ih, w_hh, b_ih, b_hh)
    assert h1.shape == (batch, hidden_size) and c1.shape == (batch, hidden_size)
    assert jnp.allclose(h1, h1_ref, atol=1e-5, rtol=1e-5)
    assert jnp.allclose(c1, c1_ref, atol=1e-5, rtol=1e-5)

    # ---- 2) T repeated cell applications in ONE pallas_call (f32 operands) ----
    h_seq, hT, cT = dplstm_cell_sequence(xs, h0, c0, params_f32, unroll=4)
    jax.block_until_ready((h_seq, hT, cT))

    h_r, c_r = h0, c0
    h_seq_ref = []
    for t in range(seq_len):
        h_r, c_r = dplstm_cell_ref(xs[t], h_r, c_r, w_ih, w_hh, b_ih, b_hh)
        h_seq_ref.append(h_r)
    h_seq_ref = jnp.stack(h_seq_ref, axis=0)
    assert jnp.allclose(h_seq, h_seq_ref, atol=1e-5, rtol=1e-5)
    assert jnp.allclose(hT, h_r, atol=1e-5, rtol=1e-5)
    assert jnp.allclose(cT, c_r, atol=1e-5, rtol=1e-5)

    # ---- 3) bf16 MXU-operand path (good on v5e/v6e/v7x); gate math stays f32 ----
    params_bf16 = prepare_params(w_ih, w_hh, b_ih, b_hh, mxu_dtype=jnp.bfloat16)
    h_seq_b, hT_b, cT_b = dplstm_cell_sequence(xs, h0, c0, params_bf16, unroll=4)
    jax.block_until_ready((h_seq_b, hT_b, cT_b))
    assert jnp.allclose(h_seq_b, h_seq_ref, atol=5e-2, rtol=5e-2)
    assert jnp.allclose(cT_b, c_r, atol=5e-2, rtol=5e-2)

    print("KERNEL_OK")
</pallas_src>

<mosaic_0001>
module attributes {stable_mosaic.version = 11 : i64} {
  func.func @dplstm_cell_kernel(%arg0: memref<8x16xf32, #tpu.memory_space<vmem>>, %arg1: memref<8x128xf32, #tpu.memory_space<vmem>>, %arg2: memref<8x128xf32, #tpu.memory_space<vmem>>, %arg3: memref<16x512xf32, #tpu.memory_space<vmem>>, %arg4: memref<128x512xf32, #tpu.memory_space<vmem>>, %arg5: memref<1x512xf32, #tpu.memory_space<vmem>>, %arg6: memref<2x8x128xf32, #tpu.memory_space<vmem>>) attributes {dimension_semantics = [], scalar_prefetch = 0 : i64, scratch_operands = 0 : i64, tpu.core_type = #tpu.core_type<tc>} {
    %c0 = arith.constant 0 : index
    %c0_0 = arith.constant 0 : index
    %0 = vector.load %arg0[%c0, %c0_0] : memref<8x16xf32, #tpu.memory_space<vmem>>, vector<8x16xf32>
    %c0_1 = arith.constant 0 : index
    %c0_2 = arith.constant 0 : index
    %1 = vector.load %arg3[%c0_1, %c0_2] : memref<16x512xf32, #tpu.memory_space<vmem>>, vector<16x512xf32>
    %cst = arith.constant dense<0.000000e+00> : vector<8x512xf32>
    %2 = tpu.matmul %0, %1, %cst {dimension_numbers = #tpu.dot_dimension_numbers<[1], [0], [0], [1], [0, 0, 1, 1], [], []>} : vector<8x16xf32>, vector<16x512xf32>, vector<8x512xf32> -> vector<8x512xf32>
    %c0_3 = arith.constant 0 : index
    %c0_4 = arith.constant 0 : index
    %3 = vector.load %arg1[%c0_3, %c0_4] : memref<8x128xf32, #tpu.memory_space<vmem>>, vector<8x128xf32>
    %c0_5 = arith.constant 0 : index
    %c0_6 = arith.constant 0 : index
    %4 = vector.load %arg4[%c0_5, %c0_6] : memref<128x512xf32, #tpu.memory_space<vmem>>, vector<128x512xf32>
    %cst_7 = arith.constant dense<0.000000e+00> : vector<8x512xf32>
    %5 = tpu.matmul %3, %4, %cst_7 {dimension_numbers = #tpu.dot_dimension_numbers<[1], [0], [0], [1], [0, 0, 1, 1], [], []>} : vector<8x128xf32>, vector<128x512xf32>, vector<8x512xf32> -> vector<8x512xf32>
    %6 = arith.addf %2, %5 : vector<8x512xf32>
    %c0_8 = arith.constant 0 : index
    %c0_9 = arith.constant 0 : index
    %7 = vector.load %arg5[%c0_8, %c0_9] : memref<1x512xf32, #tpu.memory_space<vmem>>, vector<1x512xf32>
    %8 = vector.broadcast %7 : vector<1x512xf32> to vector<8x512xf32>
    %9 = arith.addf %6, %8 : vector<8x512xf32>
    %10 = vector.extract_strided_slice %9 {offsets = [0, 0], sizes = [8, 128], strides = [1, 1]} : vector<8x512xf32> to vector<8x128xf32>
    %11 = arith.negf %10 : vector<8x128xf32>
    %12 = math.exp %11 : vector<8x128xf32>
    %cst_10 = arith.constant 1.000000e+00 : f32
    %13 = vector.broadcast %cst_10 : f32 to vector<8x128xf32>
    %14 = arith.addf %13, %12 : vector<8x128xf32>
    %15 = arith.divf %13, %14 : vector<8x128xf32>
    %16 = vector.extract_strided_slice %9 {offsets = [0, 128], sizes = [8, 128], strides = [1, 1]} : vector<8x512xf32> to vector<8x128xf32>
    %17 = arith.negf %16 : vector<8x128xf32>
    %18 = math.exp %17 : vector<8x128xf32>
    %cst_11 = arith.constant 1.000000e+00 : f32
    %19 = vector.broadcast %cst_11 : f32 to vector<8x128xf32>
    %20 = arith.addf %19, %18 : vector<8x128xf32>
    %21 = arith.divf %19, %20 : vector<8x128xf32>
    %22 = vector.extract_strided_slice %9 {offsets = [0, 256], sizes = [8, 128], strides = [1, 1]} : vector<8x512xf32> to vector<8x128xf32>
    %23 = math.tanh %22 : vector<8x128xf32>
    %24 = vector.extract_strided_slice %9 {offsets = [0, 384], sizes = [8, 128], strides = [1, 1]} : vector<8x512xf32> to vector<8x128xf32>
    %25 = arith.negf %24 : vector<8x128xf32>
    %26 = math.exp %25 : vector<8x128xf32>
    %cst_12 = arith.constant 1.000000e+00 : f32
    %27 = vector.broadcast %cst_12 : f32 to vector<8x128xf32>
    %28 = arith.addf %27, %26 : vector<8x128xf32>
    %29 = arith.divf %27, %28 : vector<8x128xf32>
    %c0_13 = arith.constant 0 : index
    %c0_14 = arith.constant 0 : index
    %30 = vector.load %arg2[%c0_13, %c0_14] : memref<8x128xf32, #tpu.memory_space<vmem>>, vector<8x128xf32>
    %31 = arith.mulf %21, %30 : vector<8x128xf32>
    %32 = arith.mulf %15, %23 : vector<8x128xf32>
    %33 = arith.addf %31, %32 : vector<8x128xf32>
    %34 = math.tanh %33 : vector<8x128xf32>
    %35 = arith.mulf %29, %34 : vector<8x128xf32>
    %c0_15 = arith.constant 0 : index
    %c0_16 = arith.constant 0 : index
    %c0_17 = arith.constant 0 : index
    %36 = vector.load %arg6[%c0_15, %c0_16, %c0_17] : memref<2x8x128xf32, #tpu.memory_space<vmem>>, vector<1x8x128xf32>
    %37 = vector.shape_cast %36 : vector<1x8x128xf32> to vector<8x128xf32>
    %38 = vector.shape_cast %35 : vector<8x128xf32> to vector<1x8x128xf32>
    tpu.vector_store %arg6[%c0_15, %c0_16, %c0_17], %38 {strides = array<i32>} : memref<2x8x128xf32, #tpu.memory_space<vmem>>, vector<1x8x128xf32>,
    %c1 = arith.constant 1 : index
    %c0_18 = arith.constant 0 : index
    %c0_19 = arith.constant 0 : index
    %39 = vector.load %arg6[%c1, %c0_18, %c0_19] : memref<2x8x128xf32, #tpu.memory_space<vmem>>, vector<1x8x128xf32>
    %40 = vector.shape_cast %39 : vector<1x8x128xf32> to vector<8x128xf32>
    %41 = vector.shape_cast %33 : vector<8x128xf32> to vector<1x8x128xf32>
    tpu.vector_store %arg6[%c1, %c0_18, %c0_19], %41 {strides = array<i32>} : memref<2x8x128xf32, #tpu.memory_space<vmem>>, vector<1x8x128xf32>,
    return
  }
}

</mosaic_0001>

<bundles_post_ra>
// kernel: tpu_custom_call.1
= control target key start
LH: loop header
LB: loop body
LE: loop exit
PB: predicated region body
PF: predicated region fallthrough
CT: control target
= control target key end

     0   :  { %11 = vsyncpa [#allocation3], 0  ;;  %s760_s0 = inlined_call_operand.hbm [shape: f32[8,16], index: 0, kind: input, shape index: {}]   ;;  %s761_s1 = inlined_call_operand.hbm [shape: f32[8,128], index: 1, kind: input, shape index: {}]   ;;  %s762_s2 = inlined_call_operand.hbm [shape: f32[8,128], index: 2, kind: input, shape index: {}]   ;;  %s763_s3 = inlined_call_operand.hbm [shape: f32[16,512], index: 3, kind: input, shape index: {}]   ;;  %s764_s4 = inlined_call_operand.hbm [shape: f32[128,512], index: 4, kind: input, shape index: {}]   ;;  %s765_s5 = inlined_call_operand.vmem [shape: f32[1,512], index: 5, kind: input, shape index: {}]   ;;  %s766_s6 = inlined_call_operand.hbm [shape: f32[2,8,128], index: 6, kind: output, shape index: {}]  }
   0x1   :  { %12 = vsyncpa [#allocation6], 0 }
   0x2   :  { %13 = vsyncpa [#allocation9], 0 }
   0x3   :  { %14 = vsyncpa [#allocation4], 0  ;;  %s681_s21 = smov [#allocation5]   ;;  %s682_s23 = smov [#allocation8]  }
   0x4   :  { %s31_s22 = sshll.u32 %s681_s21, 4  ;;  %s50_s24 = sshll.u32 %s682_s23, 4  ;;  %s32_s22 = int_to_ptr.vmem [resolvable:$true] %s31_s22  ;;  %s51_s24 = int_to_ptr.vmem [resolvable:$true] %s50_s24 }
   0x5   :  { %s561_s25 = scalar_lea.vmem %s32_s22, 128  ;;  %p566_p1 = scmp.lt.s32.totalorder %s32_s22, %s32_s22 }
   0x6   :  { %p562_p0 = scmp.ne.s32.totalorder %s32_s22, %s561_s25  ;;  %p567_p2 = scmp.lt.s32.totalorder %s561_s25, %s561_s25 }
   0x8   :  { %p568_p3 = por %p567_p2, %p566_p1 }
   0xa   :  { %p569_p4 = pnand %p568_p3, %p562_p0 }
   0xc   :  { %572 = shalt.err (!%p569_p4)
}
   0xd   :  { %34 = dma.hbm_to_vmem [thread:$0]  %s761_s1, 128, %s32_s22, [#allocation6]  }
   0xe   :  { %s581_s28 = scalar_lea.vmem %s51_s24, 1024  ;;  %p586_p6 = scmp.lt.s32.totalorder %s51_s24, %s51_s24 }
   0xf   :  { %p582_p5 = scmp.ne.s32.totalorder %s51_s24, %s581_s28  ;;  %p587_p7 = scmp.lt.s32.totalorder %s581_s28, %s581_s28 }
  0x11   :  { %p588_p8 = por %p587_p7, %p586_p6 }
  0x13   :  { %p589_p9 = pnand %p588_p8, %p582_p5 }
  0x15   :  { %592 = shalt.err (!%p589_p9)
}
  0x16   :  { %s683_s29 = smov 512   ;;  %s684_s30 = smov 32  }
  0x17   :  { %56 = dma.hbm_to_vmem [thread:$0]  %s763_s3, 1024, %s51_s24, [#allocation9], %s683_s29, %s683_s29, %s684_s30  }
  0x18   :  { %s685_s9 = smov [#allocation2]   ;;  %s686_s11 = smov [#allocation7]  }
  0x19   :  { %s21_s10 = sshll.u32 %s685_s9, 4  ;;  %s41_s1 = sshll.u32 %s686_s11, 4  ;;  %s22_s10 = int_to_ptr.vmem [resolvable:$true] %s21_s10  ;;  %s42_s1 = int_to_ptr.vmem [resolvable:$true] %s41_s1 }
  0x1a   :  { %s601_s12 = scalar_lea.vmem %s22_s10, 128  ;;  %p606_p11 = scmp.lt.s32.totalorder %s22_s10, %s22_s10 }
  0x1b   :  { %p602_p10 = scmp.ne.s32.totalorder %s22_s10, %s601_s12  ;;  %p607_p12 = scmp.lt.s32.totalorder %s601_s12, %s601_s12 }
  0x1d   :  { %p608_p13 = por %p607_p12, %p606_p11 }
  0x1f   :  { %p609_p0 = pnand %p608_p13, %p602_p10 }
  0x21   :  { %612 = shalt.err (!%p609_p0)
}
  0x22   :  { %24 = dma.hbm_to_vmem [thread:$0]  %s760_s0, 128, %s22_s10, [#allocation3]  }
  0x23   :  { %s621_s15 = scalar_lea.vmem %s42_s1, 128  ;;  %p626_p2 = scmp.lt.s32.totalorder %s42_s1, %s42_s1 }
  0x24   :  { %p622_p1 = scmp.ne.s32.totalorder %s42_s1, %s621_s15  ;;  %p627_p3 = scmp.lt.s32.totalorder %s621_s15, %s621_s15 }
  0x26   :  { %p628_p4 = por %p627_p3, %p626_p2 }
  0x28   :  { %p629_p5 = pnand %p628_p4, %p622_p1 }
  0x2a   :  { %632 = shalt.err (!%p629_p5)
}
  0x2b   :  { %44 = dma.hbm_to_vmem [thread:$0]  %s762_s2, 128, %s42_s1, [#allocation6]  }
  0x2c   :  { %s687_s17 = smov [#allocation10]  }
  0x2d   :  { %s62_s18 = sshll.u32 %s687_s17, 4  ;;  %s63_s18 = int_to_ptr.vmem [resolvable:$true] %s62_s18 }
  0x2e   :  { %s641_s19 = scalar_lea.vmem %s63_s18, 8192  ;;  %p646_p7 = scmp.lt.s32.totalorder %s63_s18, %s63_s18 }
  0x2f   :  { %p642_p6 = scmp.ne.s32.totalorder %s63_s18, %s641_s19  ;;  %p647_p8 = scmp.lt.s32.totalorder %s641_s19, %s641_s19 }
  0x31   :  { %p648_p9 = por %p647_p8, %p646_p7 }
  0x33   :  { %p649_p10 = pnand %p648_p9, %p642_p6 }
  0x35   :  { %652 = shalt.err (!%p649_p10)
}
  0x36   :  { %68 = dma.hbm_to_vmem [thread:$0]  %s764_s4, 8192, %s63_s18, [#allocation9], %s683_s29, %s683_s29, %s684_s30  }
  0x37   :  { %673 = dma.done.wait [#allocation3], 128  }
  0x38   :  { %674 = vsyncadd [#allocation3], 4294967168 }
  0x39   :  { %675 = dma.done.wait [#allocation6], 256  }
  0x3a   :  { %676 = vsyncadd [#allocation6], 4294967040 }
  0x3b   :  { %677 = dma.done.wait [#allocation9], 9216  }
  0x3c   :  { %678 = vsyncadd [#allocation9], 4294958080  ;;  %v688_v0 = vmov 0.0   ;;  %v157_v1 = vld [vmem:[#allocation10 + $0x1e8] sm:$0xff]  ;;  %v156_v2 = vld [vmem:[#allocation10 + $0x1e0] sm:$0xff]  ;;  %vm302_vm0 = vcmask 130048  }
  0x3d   :  { %224 = vmatprep.mubr.f32.mxu0 %v688_v0  ;;  %295 = vmatprep.mubr.f32.mxu1 %v688_v0  ;;  %v153_v3 = vld [vmem:[#allocation10 + $0x1c8] sm:$0xff]  ;;  %v152_v4 = vld [vmem:[#allocation10 + $0x1c0] sm:$0xff]  ;;  %v159_v8 = vld [vmem:[#allocation10 + $0x1f8] sm:$0xff] }
  0x3e   :  { %160 = vmatprep.subr.mxu0 %v157_v1  ;;  %v149_v5 = vld [vmem:[#allocation10 + $0x1a8] sm:$0xff]  ;;  %v148_v6 = vld [vmem:[#allocation10 + $0x1a0] sm:$0xff]  ;;  %231 = vmatprep.subr.mxu1 %v159_v8  ;;  %v158_v10 = vld [vmem:[#allocation10 + $0x1f0] sm:$0xff] }
  0x3f   :  { %161 = vmatpush1.msra.mxu0 %v156_v2  ;;  %v145_v7 = vld [vmem:[#allocation10 + $0x188] sm:$0xff]  ;;  %v144_v9 = vld [vmem:[#allocation10 + $0x180] sm:$0xff]  ;;  %232 = vmatpush1.msra.mxu1 %v158_v10  ;;  %v155_v12 = vld [vmem:[#allocation10 + $0x1d8] sm:$0xff] }
  0x40   :  { %162 = vmatprep.subr.mxu0 %v153_v3  ;;  %v141_v11 = vld [vmem:[#allocation10 + $0x168] sm:$0xff]  ;;  %v154_v13 = vld [vmem:[#allocation10 + $0x1d0] sm:$0xff]  ;;  %v140_v14 = vld [vmem:[#allocation10 + $0x160] sm:$0xff]  ;;  %233 = vmatprep.subr.mxu1 %v155_v12  ;;  %v450_v12 = vlaneseq }
  0x41   :  { %163 = vmatpush1.msra.mxu0 %v152_v4  ;;  %v151_v15 = vld [vmem:[#allocation10 + $0x1b8] sm:$0xff]  ;;  %v137_v16 = vld [vmem:[#allocation10 + $0x148] sm:$0xff]  ;;  %234 = vmatpush1.msra.mxu1 %v154_v13  ;;  %v150_v17 = vld [vmem:[#allocation10 + $0x1b0] sm:$0xff] }
  0x42   :  { %164 = vmatprep.subr.mxu0 %v149_v5  ;;  %v147_v18 = vld [vmem:[#allocation10 + $0x198] sm:$0xff]  ;;  %v136_v19 = vld [vmem:[#allocation10 + $0x140] sm:$0xff]  ;;  %235 = vmatprep.subr.mxu1 %v151_v15  ;;  %v146_v20 = vld [vmem:[#allocation10 + $0x190] sm:$0xff]  ;;  %v451_v13 = vshrl.u32 %v450_v12, 7 }
  0x43   :  { %165 = vmatpush1.msra.mxu0 %v148_v6  ;;  %v133_v21 = vld [vmem:[#allocation10 + $0x128] sm:$0xff]  ;;  %236 = vmatpush1.msra.mxu1 %v150_v17  ;;  %v143_v22 = vld [vmem:[#allocation10 + $0x178] sm:$0xff]  ;;  %v132_v23 = vld [vmem:[#allocation10 + $0x120] sm:$0xff] }
  0x44   :  { %166 = vmatprep.subr.mxu0 %v145_v7  ;;  %237 = vmatprep.subr.mxu1 %v147_v18  ;;  %v142_v24 = vld [vmem:[#allocation10 + $0x170] sm:$0xff]  ;;  %v129_v25 = vld [vmem:[#allocation10 + $0x108] sm:$0xff]  ;;  %v139_v26 = vld [vmem:[#allocation10 + $0x158] sm:$0xff]  ;;  %v456_v17 = vsub.s32 1, %v451_v13 }
  0x45   :  { %167 = vmatpush1.msra.mxu0 %v144_v9  ;;  %238 = vmatpush1.msra.mxu1 %v146_v20  ;;  %v128_v27 = vld [vmem:[#allocation10 + $0x100] sm:$0xff]  ;;  %v138_v28 = vld [vmem:[#allocation10 + $0x150] sm:$0xff]  ;;  %v125_v29 = vld [vmem:[#allocation10 + $0xe8] sm:$0xff] }
  0x46   :  { %168 = vmatprep.subr.mxu0 %v141_v11  ;;  %239 = vmatprep.subr.mxu1 %v143_v22  ;;  %v135_v30 = vld [vmem:[#allocation10 + $0x138] sm:$0xff]  ;;  %v124_v31 = vld [vmem:[#allocation10 + $0xe0] sm:$0xff]  ;;  %v134_v32 = vld [vmem:[#allocation10 + $0x130] sm:$0xff] }
  0x47   :  { %169 = vmatpush1.msra.mxu0 %v140_v14  ;;  %240 = vmatpush1.msra.mxu1 %v142_v24  ;;  %v121_v33 = vld [vmem:[#allocation10 + $0xc8] sm:$0xff]  ;;  %v131_v34 = vld [vmem:[#allocation10 + $0x118] sm:$0xff]  ;;  %v120_v35 = vld [vmem:[#allocation10 + $0xc0] sm:$0xff]  ;;  %v452_v14 = vsub.s32 0, %v451_v13 }
  0x48   :  { %170 = vmatprep.subr.mxu0 %v137_v16  ;;  %241 = vmatprep.subr.mxu1 %v139_v26  ;;  %v130_v36 = vld [vmem:[#allocation10 + $0x110] sm:$0xff]  ;;  %v117_v37 = vld [vmem:[#allocation10 + $0xa8] sm:$0xff]  ;;  %v127_v38 = vld [vmem:[#allocation10 + $0xf8] sm:$0xff] }
  0x49   :  { %171 = vmatpush1.msra.mxu0 %v136_v19  ;;  %242 = vmatpush1.msra.mxu1 %v138_v28  ;;  %v116_v39 = vld [vmem:[#allocation10 + $0xa0] sm:$0xff]  ;;  %v126_v40 = vld [vmem:[#allocation10 + $0xf0] sm:$0xff]  ;;  %v113_v41 = vld [vmem:[#allocation10 + $0x88] sm:$0xff] }
  0x4a   :  { %172 = vmatprep.subr.mxu0 %v133_v21  ;;  %243 = vmatprep.subr.mxu1 %v135_v30  ;;  %v123_v42 = vld [vmem:[#allocation10 + $0xd8] sm:$0xff]  ;;  %v112_v43 = vld [vmem:[#allocation10 + $0x80] sm:$0xff]  ;;  %v122_v44 = vld [vmem:[#allocation10 + $0xd0] sm:$0xff]  ;;  %v464_v30 = vsub.s32 3, %v451_v13 }
  0x4b   :  { %173 = vmatpush1.msra.mxu0 %v132_v23  ;;  %244 = vmatpush1.msra.mxu1 %v134_v32  ;;  %v109_v45 = vld [vmem:[#allocation10 + $0x68] sm:$0xff]  ;;  %v119_v46 = vld [vmem:[#allocation10 + $0xb8] sm:$0xff]  ;;  %v108_v47 = vld [vmem:[#allocation10 + $0x60] sm:$0xff] }
  0x4c   :  { %174 = vmatprep.subr.mxu0 %v129_v25  ;;  %245 = vmatprep.subr.mxu1 %v131_v34  ;;  %v118_v48 = vld [vmem:[#allocation10 + $0xb0] sm:$0xff]  ;;  %v105_v49 = vld [vmem:[#allocation10 + $0x48] sm:$0xff]  ;;  %v115_v50 = vld [vmem:[#allocation10 + $0x98] sm:$0xff] }
  0x4d   :  { %175 = vmatpush1.msra.mxu0 %v128_v27  ;;  %246 = vmatpush1.msra.mxu1 %v130_v36  ;;  %v104_v51 = vld [vmem:[#allocation10 + $0x40] sm:$0xff]  ;;  %v114_v52 = vld [vmem:[#allocation10 + $0x90] sm:$0xff]  ;;  %v101_v53 = vld [vmem:[#allocation10 + $0x28] sm:$0xff] }
  0x4e   :  { %176 = vmatprep.subr.mxu0 %v125_v29  ;;  %247 = vmatprep.subr.mxu1 %v127_v38  ;;  %v111_v54 = vld [vmem:[#allocation10 + $0x78] sm:$0xff]  ;;  %v100_v55 = vld [vmem:[#allocation10 + $0x20] sm:$0xff]  ;;  %v110_v56 = vld [vmem:[#allocation10 + $0x70] sm:$0xff] }
  0x4f   :  { %177 = vmatpush1.msra.mxu0 %v124_v31  ;;  %248 = vmatpush1.msra.mxu1 %v126_v40  ;;  %v97_v57 = vld [vmem:[#allocation10 + $0x8] sm:$0xff]  ;;  %v107_v58 = vld [vmem:[#allocation10 + $0x58] sm:$0xff]  ;;  %v96_v59 = vld [vmem:[#allocation10] sm:$0xff] }
  0x50   :  { %178 = vmatprep.subr.mxu0 %v121_v33  ;;  %249 = vmatprep.subr.mxu1 %v123_v42  ;;  %v106_v60 = vld [vmem:[#allocation10 + $0x50] sm:$0xff]  ;;  %v92_v62 = vld [vmem:[#allocation8 + $0x28] sm:$0xff]  ;;  %v91_v63 = vld [vmem:[#allocation8 + $0x20] sm:$0xff] }
  0x51   :  { %179 = vmatpush1.msra.mxu0 %v120_v35  ;;  %250 = vmatpush1.msra.mxu1 %v122_v44  ;;  %v95_v61 = vld [vmem:[#allocation5] sm:$0xff]  ;;  %v88_v1 = vld [vmem:[#allocation8 + $0x8] sm:$0xff]  ;;  %v103_v2 = vld [vmem:[#allocation10 + $0x38] sm:$0xff]  ;;  %v460_v35 = vsub.s32 2, %v451_v13 }
  0x52   :  { %180 = vmatprep.subr.mxu0 %v117_v37  ;;  %251 = vmatprep.subr.mxu1 %v119_v46  ;;  %v87_v3 = vld [vmem:[#allocation8] sm:$0xff]  ;;  %v102_v4 = vld [vmem:[#allocation10 + $0x30] sm:$0xff]  ;;  %v86_v5 = vld [vmem:[#allocation2] sm:$0xff] }
  0x53   :  { %181 = vmatpush1.msra.mxu0 %v116_v39  ;;  %252 = vmatpush1.msra.mxu1 %v118_v48  ;;  %v99_v6 = vld [vmem:[#allocation10 + $0x18] sm:$0xff]  ;;  %v98_v7 = vld [vmem:[#allocation10 + $0x10] sm:$0xff]  ;;  %v448_v16 = vld [vmem:[%s765_s5] sm:$0xf]  ;;  %s689_s5 = smov [#allocation11]  }
  0x54   :  { %182 = vmatprep.subr.mxu0 %v113_v41  ;;  %253 = vmatprep.subr.mxu1 %v115_v50  ;;  %v94_v8 = vld [vmem:[#allocation8 + $0x38] sm:$0xff]  ;;  %v93_v9 = vld [vmem:[#allocation8 + $0x30] sm:$0xff]  ;;  %v453_v19 = vrot.slane %v448_v16, %v452_v14  ;;  %v457_v22 = vrot.slane %v448_v16, %v456_v17  ;;  %v465_v34 = vrot.slane %v448_v16, %v464_v30  ;;  %s507_s21 = sshll.u32 %s689_s5, 4  ;;  %s508_s21 = int_to_ptr.vmem [resolvable:$true] %s507_s21 }
  0x55   :  { %183 = vmatpush1.msra.mxu0 %v112_v43  ;;  %254 = vmatpush1.msra.mxu1 %v114_v52  ;;  %v90_v10 = vld [vmem:[#allocation8 + $0x18] sm:$0xff]  ;;  %v89_v11 = vld [vmem:[#allocation8 + $0x10] sm:$0xff]  ;;  %v461_v38 = vrot.slane %v448_v16, %v460_v35  ;;  %s653_s22 = scalar_lea.vmem %s508_s21, 256  ;;  %p658_p12 = scmp.lt.s32.totalorder %s508_s21, %s508_s21 }
  0x56   :  { %184 = vmatprep.subr.mxu0 %v109_v45  ;;  %255 = vmatprep.subr.mxu1 %v111_v54  ;;  %p654_p11 = scmp.ne.s32.totalorder %s508_s21, %s653_s22  ;;  %p659_p13 = scmp.lt.s32.totalorder %s653_s22, %s653_s22 }
  0x57   :  { %185 = vmatpush1.msra.mxu0 %v108_v47  ;;  %256 = vmatpush1.msra.mxu1 %v110_v56  ;;  %v493_v47 = vld [vmem:[#allocation7] sm:$0xff] }
  0x58   :  { %186 = vmatprep.subr.mxu0 %v105_v49  ;;  %257 = vmatprep.subr.mxu1 %v107_v58  ;;  %p660_p0 = por %p659_p13, %p658_p12 }
  0x59   :  { %187 = vmatpush1.msra.mxu0 %v104_v51  ;;  %258 = vmatpush1.msra.mxu1 %v106_v60 }
  0x5a   :  { %188 = vmatprep.subr.mxu0 %v101_v53  ;;  %259 = vmatprep.subr.mxu1 %v103_v2  ;;  %p661_p1 = pnand %p660_p0, %p654_p11 }
  0x5b   :  { %189 = vmatpush1.msra.mxu0 %v100_v55  ;;  %260 = vmatpush1.msra.mxu1 %v102_v4 }
  0x5c   :  { %190 = vmatprep.subr.mxu0 %v97_v57  ;;  %261 = vmatprep.subr.mxu1 %v99_v6 }
  0x5d   :  { %191 = vmatpush1.msra.mxu0 %v96_v59  ;;  %262 = vmatpush1.msra.mxu1 %v98_v7 }
  0x5e   :  { %225 = vmatmul.mubr.f32.vlgmr.msra.gmra.mxu0 %v95_v61  ;;  %334 = vmatprep.subr.mxu0 %v92_v62 }
  0x5f   :  { %335 = vmatpush1.msra.mxu0 %v91_v63  ;;  %370 = vmatprep.mubr.f32.mxu0 %v688_v0 }
  0x60   :  { %336 = vmatprep.subr.mxu0 %v88_v1  ;;  %296 = vmatmul.mubr.f32.vlgmr.msra.gmra.mxu1 %v95_v61 }
  0x61   :  { %337 = vmatpush1.msra.mxu0 %v87_v3  ;;  %405 = vmatprep.subr.mxu1 %v94_v8 }
  0x62   :  { %521 = vmatmul.mubr.msk.f32.vlgmr.msra.gmra.mxu0 %vm302_vm0, %v86_v5  ;;  %406 = vmatpush1.msra.mxu1 %v93_v9 }
  0x63   :  { %441 = vmatprep.mubr.f32.mxu1 %v688_v0  ;;  %407 = vmatprep.subr.mxu1 %v90_v10 }
  0x64   :  { %408 = vmatpush1.msra.mxu1 %v89_v11 }
  0x65   :  { %522 = vmatmul.mubr.msk.f32.vlgmr.msra.gmra.mxu1 %vm302_vm0, %v86_v5 }
 0x11e   :  { %v226_v15 = vpop.f32.mrf.mxu0 }
 0x120   :  { %v228_v18 = vpop.f32.mrf.mxu0  ;;  %v297_v0 = vpop.f32.mrf.mxu1 }
 0x122   :  { %v372_v20 = vpop.f32.mrf.mxu0  ;;  %v299_v26 = vpop.f32.mrf.mxu1 }
 0x123   :  { %v373_v21 = vadd.f32 %v372_v20, %v226_v15 }
 0x124   :  { %v374_v23 = vpop.f32.mrf.mxu0 }
 0x125   :  { %v470_v24 = vadd.f32 %v453_v19, %v373_v21  ;;  %v375_v25 = vadd.f32 %v374_v23, %v228_v18  ;;  %v443_v29 = vpop.f32.mrf.mxu1 }
 0x126   :  { %v444_v37 = vadd.f32 %v443_v29, %v297_v0 }
 0x127   :  { %v523_v27 = vmul.f32 -1.442695, %v470_v24  ;;  %v471_v28 = vadd.f32 %v457_v22, %v375_v25  ;;  %v445_v32 = vpop.f32.mrf.mxu1 }
 0x128   :  { %v446_v33 = vadd.f32 %v445_v32, %v299_v26  ;;  %v472_v41 = vadd.f32 %v461_v38, %v444_v37 }
 0x129   :  { %537 = vpow2.f32 %v523_v27  ;;  %v524_v31 = vmul.f32 -1.442695, %v471_v28 }
 0x12a   :  { %v473_v36 = vadd.f32 %v465_v34, %v446_v33 }
 0x12b   :  { %539 = vpow2.f32 %v524_v31 }
 0x12c   :  { %v525_v39 = vmul.f32 -1.442695, %v473_v36 }
 0x12e   :  { %541 = vpow2.f32 %v525_v39 }
 0x136   :  { %v538_v40 = vpop.eup %537 }
 0x137   :  { %v477_v42 = vadd.f32 1.0, %v538_v40 }
 0x138   :  { %v540_v43 = vpop.eup %539 }
 0x139   :  { %543 = vrcp.f32 %v477_v42  ;;  %v483_v44 = vadd.f32 1.0, %v540_v43 }
 0x13a   :  { %545 = vtanh.f32 %v472_v41 }
 0x13b   :  { %547 = vrcp.f32 %v483_v44  ;;  %v542_v45 = vpop.eup %541 }
 0x13c   :  { %v490_v50 = vadd.f32 1.0, %v542_v45 }
 0x13e   :  { %549 = vrcp.f32 %v490_v50 }
 0x146   :  { %v544_v46 = vpop.eup %543 }
 0x147   :  { %v546_v48 = vpop.eup %545 }
 0x148   :  { %v548_v49 = vpop.eup %547  ;;  %v495_v52 = vmul.f32 %v546_v48, %v544_v46 }
 0x149   :  { %v494_v51 = vmul.f32 %v548_v49, %v493_v47 }
 0x14b   :  { %v496_v53 = vadd.f32 %v495_v52, %v494_v51  ;;  %v550_v54 = vpop.eup %549 }
 0x14d   :  { %551 = vtanh.f32 %v496_v53  ;;  %501 = vst [vmem:[#allocation11 + $0x8] sm:$0xff] %v496_v53 }
 0x15a   :  { %v552_v55 = vpop.eup %551 }
 0x15b   :  { %v498_v56 = vmul.f32 %v552_v55, %v550_v54 }
 0x15d   :  { %499 = vst [vmem:[#allocation11] sm:$0xff] %v498_v56 }
 0x15e   :  { %664 = shalt.err (!%p661_p1)
}
 0x15f   :  { %s690_s23 = smov 128   ;;  %s691_s24 = smov 8  }
 0x160   :  { %513 = dma.vmem_to_hbm [thread:$0]  %s508_s21, 256, %s766_s6, [#allocation4], %s690_s23, %s690_s23, %s691_s24  }
 0x161   :  { %679 = dma.done.wait [#allocation4], 256  }
 0x162   :  { %680 = vsyncadd [#allocation4], 4294967040 }
 0x163   :  { %517 = vsyncpa [#allocation3], 1 }
 0x164   :  { %518 = vsyncpa [#allocation6], 1 }
 0x165   :  { %519 = vsyncpa [#allocation9], 1 }
 0x166   :  { %520 = vsyncpa [#allocation4], 1 }

</bundles_post_ra>
